<compile_context>
chip_gen: v7x
topology: tpu7x:2x2x1
jax: 0.10.0
libtpu: 0.0.40
codegen_flags: <defaults>
</compile_context>

<pallas_src>
import functools

import numpy as np
import jax
import jax.numpy as jnp
from jax import lax
from jax.experimental import pallas as pl
from jax.experimental.pallas import tpu as pltpu

HP = jax.lax.Precision.HIGHEST  # used only by the pure-JAX reference


# ---------------------------- Pallas kernels ----------------------------

def _bn_relu_kernel(x_ref, scale_ref, bias_ref, o_ref):
    # out = relu(x * scale + bias); scale/bias broadcast over rows (lane-dense layout).
    o_ref[...] = jnp.maximum(x_ref[...] * scale_ref[...] + bias_ref[...], 0.0)


def _conv3x3_acc(xq_ref, w_ref, stride, OH, OW):
    """3x3 / pad-1 conv as 9 shifted-slice matmuls accumulated in f32 (in-kernel im2col).

    xq_ref block: (1, stride, stride, Hq, Wq, Cin) quad view of the zero-padded input.
    w_ref:        (9, Cin, Cout), tap index = 3*u + v.
    """
    cout = w_ref.shape[-1]
    acc = jnp.zeros((OH * OW, cout), jnp.float32)
    for u in range(3):
        for v in range(3):
            patch = xq_ref[0, u % stride, v % stride,
                           u // stride:u // stride + OH,
                           v // stride:v // stride + OW, :]           # (OH, OW, Cin)
            acc = acc + jnp.dot(patch.reshape(OH * OW, -1), w_ref[3 * u + v],
                                preferred_element_type=jnp.float32)
    return acc


def _conv1_bn_relu_kernel(xq_ref, w_ref, scale_ref, bias_ref, o_ref, *, stride, OH, OW):
    acc = _conv3x3_acc(xq_ref, w_ref, stride, OH, OW)
    # bn2 + ReLU epilogue rides in VPU slots while the MXU result drains.
    o_ref[...] = jnp.maximum(acc * scale_ref[...] + bias_ref[...], 0.0)[None]


def _conv1_bn_relu_sc_kernel(xq_ref, w_ref, scale_ref, bias_ref, wsc_ref,
                             o_ref, sc_ref, *, stride, OH, OW):
    acc = _conv3x3_acc(xq_ref, w_ref, stride, OH, OW)
    o_ref[...] = jnp.maximum(acc * scale_ref[...] + bias_ref[...], 0.0)[None]
    # Strided 1x1 shortcut conv == center tap (u = v = 1) of the same 3x3 patches.
    cp = xq_ref[0, 1 % stride, 1 % stride,
                1 // stride:1 // stride + OH,
                1 // stride:1 // stride + OW, :]
    sc_ref[...] = jnp.dot(cp.reshape(OH * OW, -1), wsc_ref[...],
                          preferred_element_type=jnp.float32)[None]


def _conv2_se_res_kernel(xq_ref, w_ref, v_ref, fc1_ref, fc2_ref, sc_ref, o_ref, *, OH, OW):
    # conv2 (3x3, stride 1, pad 1)
    o = _conv3x3_acc(xq_ref, w_ref, 1, OH, OW)                        # (S, C)
    # ENSE squeeze (all pools + upsample + shared group convs) folded into one matvec.
    z = jnp.dot(v_ref[...], o, preferred_element_type=jnp.float32)    # (1, C)
    h = jnp.maximum(jnp.dot(z, fc1_ref[...], preferred_element_type=jnp.float32), 0.0)
    s = jax.nn.sigmoid(jnp.dot(h, fc2_ref[...], preferred_element_type=jnp.float32))
    # excitation scale + residual add, fused into the same store.
    o_ref[...] = (o * s + sc_ref[0])[None]


# ---------------------------- Pallas wrappers ----------------------------

def pallas_bn_relu_nhwc(x_nhwc, scale, bias):
    """relu(x * scale + bias) per-channel, using a lane-dense (B*H, W*C) layout."""
    B, H, W, C = x_nhwc.shape
    R, L = B * H, W * C
    x2d = x_nhwc.reshape(R, L)
    s2d = jnp.tile(scale, W).reshape(1, L)
    b2d = jnp.tile(bias, W).reshape(1, L)
    # Two row-blocks when legal so both v7x TensorCores get work.
    tr = R // 2 if (R % 2 == 0 and (R // 2) % 8 == 0) else R
    out = pl.pallas_call(
        _bn_relu_kernel,
        out_shape=jax.ShapeDtypeStruct((R, L), jnp.float32),
        grid=(R // tr,),
        in_specs=[pl.BlockSpec((tr, L), lambda i: (i, 0)),
                  pl.BlockSpec((1, L), lambda i: (0, 0)),
                  pl.BlockSpec((1, L), lambda i: (0, 0))],
        out_specs=pl.BlockSpec((tr, L), lambda i: (i, 0)),
        compiler_params=pltpu.CompilerParams(dimension_semantics=("parallel",)),
    )(x2d, s2d, b2d)
    return out.reshape(B, H, W, C)


def space_to_quad(x_nhwc, stride):
    """Zero-pad by 1 and rearrange so stride-s tap sampling becomes static slicing.

    Returns (B, stride, stride, Hq, Wq, C) with [b, p, q, i, j, c] = padded[b, s*i+p, s*j+q, c].
    Pure data movement (~1x the input) done by XLA outside the kernel.
    """
    B, H, W, C = x_nhwc.shape
    xp = jnp.pad(x_nhwc, ((0, 0), (1, 1), (1, 1), (0, 0)))
    Hp, Wp = H + 2, W + 2
    Hq = -(-Hp // stride)
    Wq = -(-Wp // stride)
    xp = jnp.pad(xp, ((0, 0), (0, Hq * stride - Hp), (0, Wq * stride - Wp), (0, 0)))
    return xp.reshape(B, Hq, stride, Wq, stride, C).transpose(0, 2, 4, 1, 3, 5)


def pallas_conv1(a_nhwc, w_taps, bn2_scale, bn2_bias, stride, w_sc=None):
    """conv1 (3x3, stride, pad 1) + bn2 + ReLU epilogue (+ fused strided 1x1 shortcut)."""
    B, H, W, Cin = a_nhwc.shape
    OH = (H - 1) // stride + 1
    OW = (W - 1) // stride + 1
    planes = w_taps.shape[-1]
    xq = space_to_quad(a_nhwc, stride)
    _, s, _, Hq, Wq, _ = xq.shape
    scale2 = bn2_scale.reshape(1, planes)
    bias2 = bn2_bias.reshape(1, planes)
    in_specs = [
        pl.BlockSpec((1, s, s, Hq, Wq, Cin), lambda b: (b, 0, 0, 0, 0, 0)),
        pl.BlockSpec((9, Cin, planes), lambda b: (0, 0, 0)),
        pl.BlockSpec((1, planes), lambda b: (0, 0)),
        pl.BlockSpec((1, planes), lambda b: (0, 0)),
    ]
    cp = pltpu.CompilerParams(dimension_semantics=("parallel",))
    if w_sc is None:
        kernel = functools.partial(_conv1_bn_relu_kernel, stride=stride, OH=OH, OW=OW)
        return pl.pallas_call(
            kernel,
            out_shape=jax.ShapeDtypeStruct((B, OH * OW, planes), jnp.float32),
            grid=(B,),
            in_specs=in_specs,
            out_specs=pl.BlockSpec((1, OH * OW, planes), lambda b: (b, 0, 0)),
            compiler_params=cp,
        )(xq, w_taps, scale2, bias2)
    kernel = functools.partial(_conv1_bn_relu_sc_kernel, stride=stride, OH=OH, OW=OW)
    in_specs.append(pl.BlockSpec((Cin, planes), lambda b: (0, 0)))
    return pl.pallas_call(
        kernel,
        out_shape=(jax.ShapeDtypeStruct((B, OH * OW, planes), jnp.float32),
                   jax.ShapeDtypeStruct((B, OH * OW, planes), jnp.float32)),
        grid=(B,),
        in_specs=in_specs,
        out_specs=(pl.BlockSpec((1, OH * OW, planes), lambda b: (b, 0, 0)),
                   pl.BlockSpec((1, OH * OW, planes), lambda b: (b, 0, 0))),
        compiler_params=cp,
    )(xq, w_taps, scale2, bias2, w_sc)


def pallas_conv2_se_res(o1_nhwc, sc_bsc, w_taps, se):
    """conv2 (3x3, s1, pad 1) + folded ENSE squeeze + sigmoid scale + residual add."""
    B, OH, OW, planes = o1_nhwc.shape
    S = OH * OW
    xq = space_to_quad(o1_nhwc, 1)                 # (B, 1, 1, OH+2, OW+2, planes)
    Hq, Wq = OH + 2, OW + 2
    v, fc1t, fc2t = se["v"], se["fc1t"], se["fc2t"]
    kernel = functools.partial(_conv2_se_res_kernel, OH=OH, OW=OW)
    return pl.pallas_call(
        kernel,
        out_shape=jax.ShapeDtypeStruct((B, S, planes), jnp.float32),
        grid=(B,),
        in_specs=[pl.BlockSpec((1, 1, 1, Hq, Wq, planes), lambda b: (b, 0, 0, 0, 0, 0)),
                  pl.BlockSpec((9, planes, planes), lambda b: (0, 0, 0)),
                  pl.BlockSpec((1, S), lambda b: (0, 0)),
                  pl.BlockSpec(fc1t.shape, lambda b: (0, 0)),
                  pl.BlockSpec(fc2t.shape, lambda b: (0, 0)),
                  pl.BlockSpec((1, S, planes), lambda b: (b, 0, 0))],
        out_specs=pl.BlockSpec((1, S, planes), lambda b: (b, 0, 0)),
        compiler_params=pltpu.CompilerParams(dimension_semantics=("parallel",)),
    )(xq, w_taps, v, fc1t, fc2t, sc_bsc)


# ---------------------------- Parameter / constant setup ----------------------------

def conv_w_to_taps(w):
    """torch (Cout, Cin, 3, 3) -> (9, Cin, Cout); tap index = 3*u + v."""
    Cout, Cin, kh, kw = w.shape
    return jnp.transpose(w, (2, 3, 1, 0)).reshape(kh * kw, Cin, Cout)


def build_se_constants(H, W, g1_w, g2_w, fc1_w, fc2_w):
    """Fold the whole ENSE squeeze path into one (1, S) row v, so z = v @ x (x in (S,C))."""
    assert H % 4 == 0 and W % 4 == 0, "ENSE squeeze fold requires spatial dims divisible by 4"
    S = H * W
    p2t = np.zeros((4, S), np.float32)   # adaptive avg-pool -> 2x2
    p4t = np.zeros((16, S), np.float32)  # adaptive avg-pool -> 4x4
    for h in range(H):
        for w in range(W):
            p2t[(h // (H // 2)) * 2 + (w // (W // 2)), h * W + w] = 1.0 / ((H // 2) * (W // 2))
            p4t[(h // (H // 4)) * 4 + (w // (W // 4)), h * W + w] = 1.0 / ((H // 4) * (W // 4))
    u2t = np.zeros((16, 4), np.float32)  # nearest upsample 2x2 -> 4x4
    for fh in range(4):
        for fw in range(4):
            u2t[fh * 4 + fw, (fh // 2) * 2 + (fw // 2)] = 1.0
    # ShareGroupConv weight (1, 3, 3, 3): per-source 3x3 conv (4x4 -> 2x2) as (4, 16) matrices
    w1 = np.asarray(g1_w)[0]
    A = np.zeros((3, 4, 16), np.float32)
    for k in range(3):
        for p in range(2):
            for q in range(2):
                for u in range(3):
                    for v in range(3):
                        A[k, 2 * p + q, 4 * (p + u) + (q + v)] += w1[k, u, v]
    # ShareGroupConv2 weight (1, 1, 3, 3): stride 3 / pad 1 on a 2x2 map -> only taps [1:3,1:3]
    w2 = np.asarray(g2_w)[0, 0]
    w2row = w2[1:3, 1:3].reshape(1, 4)
    # z = w2row @ [A0 @ (mean->up) + A1 @ u2t @ p2t + A2 @ p4t] @ x  ==  v @ x
    up1 = np.full((16, S), 1.0 / S, np.float32)
    m = A[0] @ up1 + A[1] @ (u2t @ p2t) + A[2] @ p4t     # (4, S)
    v = w2row @ m                                        # (1, S)
    return dict(v=jnp.asarray(v),
                fc1t=jnp.asarray(np.asarray(fc1_w).T),
                fc2t=jnp.asarray(np.asarray(fc2_w).T))


def init_params(key, in_planes, planes, stride, reduction=16):
    ks = jax.random.split(key, 10)
    eps = 1e-5

    def bn(k, c):
        k1, k2, k3, k4 = jax.random.split(k, 4)
        gamma = 1.0 + 0.1 * jax.random.normal(k1, (c,), jnp.float32)
        beta = 0.1 * jax.random.normal(k2, (c,), jnp.float32)
        rmean = 0.1 * jax.random.normal(k3, (c,), jnp.float32)
        rvar = jax.random.uniform(k4, (c,), jnp.float32, 0.5, 1.5)
        scale = gamma / jnp.sqrt(rvar + eps)
        return scale, beta - rmean * scale

    bn1_scale, bn1_bias = bn(ks[0], in_planes)
    bn2_scale, bn2_bias = bn(ks[1], planes)
    w1 = 0.1 * jax.random.normal(ks[2], (planes, in_planes, 3, 3), jnp.float32)
    w2 = 0.1 * jax.random.normal(ks[3], (planes, planes, 3, 3), jnp.float32)
    g1_w = 0.3 * jax.random.normal(ks[4], (1, 3, 3, 3), jnp.float32)
    g2_w = 0.3 * jax.random.normal(ks[5], (1, 1, 3, 3), jnp.float32)
    fc1_w = 0.3 * jax.random.normal(ks[6], (planes // reduction, planes), jnp.float32)
    fc2_w = 0.3 * jax.random.normal(ks[7], (planes, planes // reduction), jnp.float32)
    P = dict(stride=stride,
             bn1_scale=bn1_scale, bn1_bias=bn1_bias,
             bn2_scale=bn2_scale, bn2_bias=bn2_bias,
             w1=w1, w2=w2, g1_w=g1_w, g2_w=g2_w, fc1_w=fc1_w, fc2_w=fc2_w,
             w1_9=conv_w_to_taps(w1), w2_9=conv_w_to_taps(w2))
    if stride != 1 or in_planes != planes:
        w_sc = 0.1 * jax.random.normal(ks[8], (planes, in_planes, 1, 1), jnp.float32)
        P["w_sc"] = w_sc
        P["w_sc_mat"] = jnp.transpose(w_sc[:, :, 0, 0], (1, 0))
    return P


# ---------------------------- Forward pass (Pallas) ----------------------------

def preact_block_forward(x_nchw, P):
    B, Cin, H, W = x_nchw.shape
    stride = P["stride"]
    planes = P["w1_9"].shape[-1]
    OH = (H - 1) // stride + 1
    OW = (W - 1) // stride + 1
    x_nhwc = jnp.transpose(x_nchw, (0, 2, 3, 1))

    # a = relu(bn1(x))  (lane-dense elementwise kernel)
    a_nhwc = pallas_bn_relu_nhwc(x_nhwc, P["bn1_scale"], P["bn1_bias"])

    # conv1 (+ fused bn2/ReLU epilogue, + fused strided 1x1 shortcut conv via center tap)
    if "w_sc_mat" in P:
        o1_bsc, sc_bsc = pallas_conv1(a_nhwc, P["w1_9"], P["bn2_scale"], P["bn2_bias"],
                                      stride, w_sc=P["w_sc_mat"])
    else:
        o1_bsc = pallas_conv1(a_nhwc, P["w1_9"], P["bn2_scale"], P["bn2_bias"], stride)
        sc_bsc = x_nhwc.reshape(B, H * W, Cin)      # identity shortcut

    o1_nhwc = o1_bsc.reshape(B, OH, OW, planes)

    # conv2 + folded ENSE squeeze + sigmoid scale + residual add (single fused kernel)
    out_bsc = pallas_conv2_se_res(o1_nhwc, sc_bsc, P["w2_9"], P["se_consts"])
    return jnp.transpose(out_bsc.reshape(B, OH, OW, planes), (0, 3, 1, 2))


# ---------------------------- Pure-JAX reference (f32 HIGHEST) ----------------------------

def ref_forward(x, P):
    dn = ("NCHW", "OIHW", "NCHW")
    stride = P["stride"]
    a = jnp.maximum(x * P["bn1_scale"][None, :, None, None]
                    + P["bn1_bias"][None, :, None, None], 0.0)
    if "w_sc" in P:
        sc = lax.conv_general_dilated(a, P["w_sc"], (stride, stride), "VALID",
                                      dimension_numbers=dn, precision=HP)
    else:
        sc = x
    o = lax.conv_general_dilated(a, P["w1"], (stride, stride), ((1, 1), (1, 1)),
                                 dimension_numbers=dn, precision=HP)
    o = jnp.maximum(o * P["bn2_scale"][None, :, None, None]
                    + P["bn2_bias"][None, :, None, None], 0.0)
    o = lax.conv_general_dilated(o, P["w2"], (1, 1), ((1, 1), (1, 1)),
                                 dimension_numbers=dn, precision=HP)
    B, C, H, W = o.shape
    y1 = jnp.broadcast_to(o.mean(axis=(2, 3), keepdims=True), (B, C, 4, 4))
    y2 = o.reshape(B, C, 2, H // 2, 2, W // 2).mean(axis=(3, 5))
    y2 = jnp.repeat(jnp.repeat(y2, 2, axis=2), 2, axis=3)
    y4 = o.reshape(B, C, 4, H // 4, 4, W // 4).mean(axis=(3, 5))
    ycat = jnp.stack([y1, y2, y4], axis=2).reshape(B * C, 3, 4, 4)
    g = lax.conv_general_dilated(ycat, P["g1_w"], (1, 1), "VALID",
                                 dimension_numbers=dn, precision=HP)
    z = lax.conv_general_dilated(g, P["g2_w"], (3, 3), ((1, 1), (1, 1)),
                                 dimension_numbers=dn, precision=HP).reshape(B, C)
    h = jnp.maximum(jnp.dot(z, P["fc1_w"].T, precision=HP), 0.0)
    s = jax.nn.sigmoid(jnp.dot(h, P["fc2_w"].T, precision=HP))
    return o * s[:, :, None, None] + sc


# ---------------------------- Main ----------------------------

if __name__ == "__main__":
    key = jax.random.PRNGKey(0)
    kx, kp = jax.random.split(key)
    B, in_planes, planes, stride = 2, 16, 32, 2
    H = W = 16
    x = jax.random.normal(kx, (B, in_planes, H, W), jnp.float32)

    P = init_params(kp, in_planes, planes, stride)
    OH = (H - 1) // stride + 1
    OW = (W - 1) // stride + 1
    P["se_consts"] = build_se_constants(OH, OW, P["g1_w"], P["g2_w"],
                                        P["fc1_w"], P["fc2_w"])

    out = jax.block_until_ready(preact_block_forward(x, P))

    # Reference uses f32 HIGHEST; the kernels run single-pass bf16 MXU (default precision),
    # so the comparison tolerance is loosened (observed error ~1e-2 max; structural bugs O(1)).
    ref = jax.block_until_ready(ref_forward(x, P))
    np.testing.assert_allclose(np.asarray(out), np.asarray(ref), rtol=5e-2, atol=5e-2)
    print("KERNEL_OK")
</pallas_src>

<mosaic_0001>
module attributes {stable_mosaic.version = 11 : i64} {
  func.func @_bn_relu_kernel(%arg0: i32, %arg1: memref<16x256xf32, #tpu.memory_space<vmem>>, %arg2: memref<1x256xf32, #tpu.memory_space<vmem>>, %arg3: memref<1x256xf32, #tpu.memory_space<vmem>>, %arg4: memref<16x256xf32, #tpu.memory_space<vmem>>) attributes {dimension_semantics = [#tpu.dimension_semantics<parallel>], iteration_bounds = array<i64: 2>, scalar_prefetch = 0 : i64, scratch_operands = 0 : i64, tpu.core_type = #tpu.core_type<tc>, window_params = [{transform_indices = @transform_0, window_bounds = array<i64: 16, 256>}, {pipeline_mode = #tpu.pipeline_mode<synchronous>, transform_indices = @transform_1, window_bounds = array<i64: 1, 256>}, {pipeline_mode = #tpu.pipeline_mode<synchronous>, transform_indices = @transform_2, window_bounds = array<i64: 1, 256>}, {transform_indices = @transform_3, window_bounds = array<i64: 16, 256>}]} {
    %c0 = arith.constant 0 : index
    %c0_0 = arith.constant 0 : index
    %0 = vector.load %arg1[%c0, %c0_0] : memref<16x256xf32, #tpu.memory_space<vmem>>, vector<16x256xf32>
    %c0_1 = arith.constant 0 : index
    %c0_2 = arith.constant 0 : index
    %1 = vector.load %arg2[%c0_1, %c0_2] : memref<1x256xf32, #tpu.memory_space<vmem>>, vector<1x256xf32>
    %2 = vector.broadcast %1 : vector<1x256xf32> to vector<16x256xf32>
    %3 = arith.mulf %0, %2 : vector<16x256xf32>
    %c0_3 = arith.constant 0 : index
    %c0_4 = arith.constant 0 : index
    %4 = vector.load %arg3[%c0_3, %c0_4] : memref<1x256xf32, #tpu.memory_space<vmem>>, vector<1x256xf32>
    %5 = vector.broadcast %4 : vector<1x256xf32> to vector<16x256xf32>
    %6 = arith.addf %3, %5 : vector<16x256xf32>
    %cst = arith.constant 0.000000e+00 : f32
    %7 = vector.broadcast %cst : f32 to vector<16x256xf32>
    %8 = arith.maximumf %6, %7 : vector<16x256xf32>
    %c0_5 = arith.constant 0 : index
    %c0_6 = arith.constant 0 : index
    %9 = vector.load %arg4[%c0_5, %c0_6] : memref<16x256xf32, #tpu.memory_space<vmem>>, vector<16x256xf32>
    tpu.vector_store %arg4[%c0_5, %c0_6], %8 {strides = array<i32>} : memref<16x256xf32, #tpu.memory_space<vmem>>, vector<16x256xf32>,
    return
  }
  func.func @transform_0(%arg0: i32) -> (i32, i32) {
    %c0_i32 = arith.constant 0 : i32
    %c0_i32_0 = arith.constant 0 : i32
    return %arg0, %c0_i32 : i32, i32
  }
  func.func @transform_1(%arg0: i32) -> (i32, i32) {
    %c0_i32 = arith.constant 0 : i32
    %c0_i32_0 = arith.constant 0 : i32
    %c0_i32_1 = arith.constant 0 : i32
    return %c0_i32, %c0_i32_0 : i32, i32
  }
  func.func @transform_2(%arg0: i32) -> (i32, i32) {
    %c0_i32 = arith.constant 0 : i32
    %c0_i32_0 = arith.constant 0 : i32
    %c0_i32_1 = arith.constant 0 : i32
    return %c0_i32, %c0_i32_0 : i32, i32
  }
  func.func @transform_3(%arg0: i32) -> (i32, i32) {
    %c0_i32 = arith.constant 0 : i32
    %c0_i32_0 = arith.constant 0 : i32
    return %arg0, %c0_i32 : i32, i32
  }
}

</mosaic_0001>

<bundles_post_ra>
// kernel: tpu_custom_call.1
= control target key start
LH: loop header
LB: loop body
LE: loop exit
PB: predicated region body
PF: predicated region fallthrough
CT: control target
= control target key end

     0   :  { %8 = vsyncpa [#allocation3], 0  ;;  %s686_s0 = inlined_call_operand.hbm [shape: f32[32,256], index: 0, kind: input, shape index: {}]   ;;  %s687_s1 = inlined_call_operand.vmem [shape: f32[1,256], index: 1, kind: input, shape index: {}]   ;;  %s688_s2 = inlined_call_operand.vmem [shape: f32[1,256], index: 2, kind: input, shape index: {}]   ;;  %s689_s3 = inlined_call_operand.hbm [shape: f32[32,256], index: 3, kind: output, shape index: {}]  }
   0x1   :  { %10 = vsyncpa [#allocation3 + $0x1], 0 }
   0x2   :  { %11 = vsyncpa [#allocation4], 0 }
   0x3   :  { %13 = vsyncpa [#allocation4 + $0x1], 0  ;;  %s518_s12 = smov 0   ;;  %s520_s13 = smov 0  }
   0x4   :  { %s522_s14 = smov 0   ;;  %s524_s15 = smov 0  }
   0x5 LB: > { %s539_s16 = sadd.s32 4294967295, %s490_s15   ;;  %s324_s17 = sadd.s32 4294967294, %s490_s15   ;;  %s490_s15 = sphi %s524_s15, %s702_s15   ;;  %s486_s14 = sphi %s522_s14, %s701_s14   ;;  %s482_s13 = sphi %s520_s13, %s700_s13   ;;  %s478_s12 = sphi %s518_s12, %s699_s12  }
   0x6   : > { %s543_s18 = sadd.s32 1, %s490_s15   ;;  %s26_s19 = sadd.s32 1, %s486_s14 }
   0x7   : > { %s23_s20 = ssub.s32 %s490_s15, %s543_s18  ;;  %p33_p0 = scmp.ne.s32.totalorder %s486_s14, %s482_s13 }
   0x8   : > { %p24_p1 = scmp.eq.s32.totalorder %s23_s20, 0  ;;  %p34_p2 = scmp.eq.s32.totalorder %s490_s15, 0 }
   0x9   : > { %p39_p3 = scmp.ne.s32.totalorder %s482_s13, %s478_s12  ;;  %p40_p4 = scmp.eq.s32.totalorder %s539_s16, 0 }
   0xa   : > { %s555_s21 = scalar_select %p24_p1, %s486_s14, %s26_s19  }
   0xb   : > { %p557_p5 = por %p34_p2, %p33_p0  ;;  %p561_p6 = por %p40_p4, %p39_p3 }
   0xc   : > { %p105_p7 = scmp.eq.s32.totalorder %s539_s16, 1  ;;  %p111_p8 = scmp.eq.s32.totalorder %s324_s17, 1 }
   0xd   : > { %p356_p10 = scmp.lt.s32.totalorder %s490_s15, 2  ;;  %s137_s26 = sand.u32 1, %s486_s14  }
   0xe   : > { %p568_p11 = por %p105_p7, %p33_p0  ;;  %p572_p12 = por %p111_p8, %p39_p3 }
   0xf   : > { %s341_s27 = sshll.u32 %s490_s15, 9  ;;  %s327_s28 = sshll.u32 %s137_s26, 5 }
  0x10   : > { %s693_s24 = scalar_select %p568_p11, 1, 0 }
  0x11   : > { %s694_s25 = scalar_select %p572_p12, 1, 0 }
  0x12   : > { %s581_s4 = scalar_lea.hbm %s686_s0, %s341_s27  ;;  %s141_s5 = scalar_lea.vmem [#allocation2], %s327_s28 }
  0x13   : > { %s149_s6 = sshll.u32 %s141_s5, 4  ;;  %p585_p13 = pnand %p356_p10, %p557_p5  ;;  %s589_s6 = int_to_ptr.vmem [resolvable:$true] %s149_s6 }
  0x14   : > { %s591_s8 = scalar_lea.sflag [#allocation3], %s137_s26  ;;  %s394_s9 = scalar_lea.hbm %s581_s4, 512 }
  0x15   : > { %p395_p0 = scmp.ne.s32.totalorder %s581_s4, %s394_s9  ;;  %p396_p1 = pneg %p585_p13 }
  0x16   : > { %s399_s17 = scalar_lea.hbm %s686_s0, 1024  ;;  %p400_p4 = scmp.lt.u32.totalorder %s581_s4, %s686_s0 }
  0x17   : > { %p397_p2 = pnand %p396_p1, %p395_p0  ;;  %p401_p5 = scmp.lt.u32.totalorder %s399_s17, %s394_s9 }
  0x18   : > { %p403_p8 = scmp.lt.u32.totalorder %s394_s9, %s581_s4 }
  0x19   : > { %p398_p3 = pneg %p397_p2  ;;  %p402_p7 = por %p401_p5, %p400_p4 }
  0x1b   : > { %p404_p10 = por %p403_p8, %p402_p7 }
  0x1d   : > { %p405_p9 = pnand %p404_p10, %p398_p3 }
  0x1f   : > { %408 = shalt.err (!%p405_p9)
}
  0x20   : > { %s409_s22 = scalar_lea.vmem %s589_s6, 512  ;;  %s492_s26 = smov [#allocation2]  }
  0x21   : > { %p410_p0 = scmp.ne.s32.totalorder %s589_s6, %s409_s22  ;;  %s414_s27 = sshll.u32 %s492_s26, 4  ;;  %s415_s27 = int_to_ptr.vmem [resolvable:$false] %s414_s27 }
  0x22   : > { %s416_s28 = scalar_lea.vmem %s415_s27, 1024  ;;  %p417_p11 = scmp.lt.s32.totalorder %s589_s6, %s415_s27 }
  0x23   : > { %p412_p2 = pnand %p410_p0, %p396_p1  ;;  %p418_p4 = scmp.lt.s32.totalorder %s416_s28, %s409_s22 }
  0x25   : > { %p413_p12 = pneg %p412_p2  ;;  %p419_p5 = por %p418_p4, %p417_p11 }
  0x27   : > { %p420_p7 = pnand %p419_p5, %p413_p12 }
  0x29   : > { %423 = shalt.err (!%p420_p7)
}
  0x2a   : > { %s493_s29 = smov 256   ;;  %s494_s30 = smov 16  }
  0x2b   : > { %351 = dma.hbm_to_vmem [thread:$0]  (!%p585_p13), %s581_s4, 512, %s589_s6, %s591_s8, %s493_s29, %s493_s29, %s494_s30  }
  0x2c   : > { %p331_p9 = scmp.ge.s32.totalorder %s490_s15, 1  ;;  %p157_p1 = scmp.lt.s32.totalorder %s490_s15, 3 }
  0x2e   : > { %p158_p3 = pnand %p331_p9, %p157_p1 }
  0x2f   : > { %s622_s5 = sand.u32 (!%p158_p3), 1, %s482_s13  }
  0x30   : > { %161 = sbr.rel (%p158_p3) target bundleno = 86 (0x56), region = 32  ;;  %s332_s9 = sshll.u32 (!%p158_p3), %s622_s5, 5 }
  0x31   : > { %s164_s10 = scalar_lea.sflag (!%p158_p3), [#allocation3], %s622_s5  ;;  %s167_s11 = scalar_lea.vmem (!%p158_p3), [#allocation2], %s332_s9 }
  0x37   : > { %469 = dma.done.wait (%p561_p6), %s164_s10, 512  }
  0x38   : > { %471 = vsyncadd (%p561_p6), %s164_s10, 4294966784  ;;  %v198_v0 = vlaneseq  ;;  %v192_v4 = vld [vmem:[%s167_s11] sm:$0xff]  ;;  %v193_v9 = vld [vmem:[%s167_s11 + $0x8] sm:$0xff]  ;;  %s189_s23 = scalar_lea.vmem [#allocation5], %s332_s9  ;;  %s343_s19 = sshll.u32 %s539_s16, 9 }
  0x39   : > { %v196_v5 = vld [vmem:[%s687_s1] sm:$0x3]  ;;  %v194_v12 = vld [vmem:[%s167_s11 + $0x10] sm:$0xff]  ;;  %v195_v13 = vld [vmem:[%s167_s11 + $0x18] sm:$0xff]  ;;  %s251_s17 = sshll.u32 %s189_s23, 4  ;;  %s642_s26 = scalar_lea.hbm %s689_s3, %s343_s19  ;;  %s637_s17 = int_to_ptr.vmem [resolvable:$true] %s251_s17 }
  0x3a   : > { %v199_v1 = vshrl.u32 %v198_v0, 7  ;;  %v212_v6 = vld [vmem:[%s688_s2] sm:$0x3]  ;;  %s237_s16 = scalar_lea.sflag [#allocation4], %s622_s5  ;;  %s424_s27 = scalar_lea.vmem %s637_s17, 512 }
  0x3b   : > { %p425_p6 = scmp.ne.s32.totalorder %s637_s17, %s424_s27  ;;  %p696_p11 = scmp.ne.s32.totalorder %s693_s24, 0 }
  0x3c   : > { %v200_v2 = vsub.s32 0, %v199_v1  ;;  %v204_v3 = vsub.s32 1, %v199_v1  ;;  %s495_s28 = smov [#allocation5]  }
  0x3d   : > { %p426_p12 = pnand %p425_p6, %p696_p11  ;;  %s428_s29 = sshll.u32 %s495_s28, 4  ;;  %s429_s29 = int_to_ptr.vmem [resolvable:$false] %s428_s29 }
  0x3e   : > { %v201_v7 = vrot.slane %v196_v5, %v200_v2  ;;  %v217_v8 = vrot.slane %v212_v6, %v200_v2  ;;  %v205_v10 = vrot.slane %v196_v5, %v204_v3  ;;  %v221_v11 = vrot.slane %v212_v6, %v204_v3  ;;  %s430_s30 = scalar_lea.vmem %s429_s29, 1024  ;;  %p431_p8 = scmp.lt.s32.totalorder %s637_s17, %s429_s29 }
  0x3f   : > { %p427_p13 = pneg %p426_p12  ;;  %p432_p10 = scmp.lt.s32.totalorder %s430_s30, %s424_s27 }
  0x40   : > { %v208_v14 = vmul.f32 %v201_v7, %v192_v4  ;;  %v209_v15 = vmul.f32 %v205_v10, %v193_v9  ;;  %v210_v16 = vmul.f32 %v201_v7, %v194_v12  ;;  %v211_v17 = vmul.f32 %v205_v10, %v195_v13 }
  0x41   : > { %p433_p0 = por %p432_p10, %p431_p8 }
  0x42   : > { %v224_v18 = vadd.f32 %v217_v8, %v208_v14  ;;  %v225_v19 = vadd.f32 %v221_v11, %v209_v15  ;;  %v226_v20 = vadd.f32 %v217_v8, %v210_v16  ;;  %v227_v21 = vadd.f32 %v221_v11, %v211_v17 }
  0x43   : > { %p434_p2 = pnand %p433_p0, %p427_p13 }
  0x44   : > { %v228_v22 = vmax.f32 %v224_v18, 0.0  ;;  %v229_v23 = vmax.f32 %v225_v19, 0.0  ;;  %v230_v24 = vmax.f32 %v226_v20, 0.0  ;;  %v231_v25 = vmax.f32 %v227_v21, 0.0 }
  0x46   : > { %232 = vst [vmem:[%s189_s23] sm:$0xff] %v228_v22  ;;  %233 = vst [vmem:[%s189_s23 + $0x8] sm:$0xff] %v229_v23 }
  0x47   : > { %234 = vst [vmem:[%s189_s23 + $0x10] sm:$0xff] %v230_v24  ;;  %235 = vst [vmem:[%s189_s23 + $0x18] sm:$0xff] %v231_v25 }
  0x48   : > { %437 = shalt.err (!%p434_p2)
}
  0x49   : > { %s438_s9 = scalar_lea.hbm %s642_s26, 512  ;;  %s442_s4 = scalar_lea.hbm %s689_s3, 1024 }
  0x4a   : > { %p439_p4 = scmp.ne.s32.totalorder %s642_s26, %s438_s9  ;;  %p443_p9 = scmp.lt.u32.totalorder %s642_s26, %s689_s3 }
  0x4b   : > { %p444_p1 = scmp.lt.u32.totalorder %s442_s4, %s438_s9  ;;  %p446_p6 = scmp.lt.u32.totalorder %s438_s9, %s642_s26 }
  0x4c   : > { %p440_p5 = pnand %p439_p4, %p696_p11 }
  0x4d   : > { %p445_p3 = por %p444_p1, %p443_p9 }
  0x4e   : > { %p441_p7 = pneg %p440_p5 }
  0x4f   : > { %p447_p12 = por %p446_p6, %p445_p3 }
  0x51   : > { %p448_p13 = pnand %p447_p12, %p441_p7 }
  0x53   : > { %451 = shalt.err (!%p448_p13)
}
  0x54   : > { %s496_s8 = smov 256   ;;  %s497_s23 = smov 16  }
  0x55   : > { %346 = dma.vmem_to_hbm [thread:$0]  (%p696_p11), %s637_s17, 512, %s642_s26, %s237_s16, %s496_s8, %s496_s8, %s497_s23  }
  0x56 PF: > { %s266_s19 = sand.u32 1, %s478_s12   ;;  %p697_p8 = scmp.ne.s32.totalorder %s694_s25, 0 }
  0x57   : > { %p698_p10 = scmp.ge.s32.totalorder %s490_s15, 2  ;;  %s267_s20 = scalar_lea.sflag [#allocation4], %s266_s19 }
  0x59   : > { %p353_p0 = pnand %p698_p10, %p697_p8 }
  0x5b   : > { %473 = dma.done.wait (!%p353_p0), %s267_s20, 512  }
  0x5c   : > { %475 = vsyncadd (!%p353_p0), %s267_s20, 4294966784  ;;  %p16_p2 = scmp.ge.s32.totalorder %s543_s18, 4   ;;  %s699_s12 = smov %s482_s13 }
  0x5d   : > { %s700_s13 = smov %s486_s14  ;;  %s701_s14 = smov %s555_s21 }
  0x5e   : > { %s702_s15 = smov %s543_s18  ;;  %18 = sbr.rel (!%p16_p2) target bundleno = 5 (0x5), region = 77 }
  0x65   :  { %272 = vsyncpa [#allocation3], 1 }
  0x66   :  { %274 = vsyncpa [#allocation3 + $0x1], 1 }
  0x67   :  { %275 = vsyncpa [#allocation4], 1 }
  0x68   :  { %277 = vsyncpa [#allocation4 + $0x1], 1 }

</bundles_post_ra>
